<compile_context>
chip_gen: v6e
topology: v6e:2x2x1
jax: 0.10.0
libtpu: 0.0.40
codegen_flags: <defaults>
</compile_context>

<pallas_src>
import jax
import jax.numpy as jnp
from jax.experimental import pallas as pl
from jax.experimental.pallas import tpu as pltpu

F_BIAS = 1.0
ZONEOUT_KEEP_H = 0.7
ZONEOUT_KEEP_C = 0.7
LN_EPS = 1e-5


def lstm_seq_kernel(x_ref, h0_ref, c0_ref,
                    wx_ref, wh_ref, b_ref,
                    g1_ref, b1_ref, g2_ref, b2_ref,
                    s8_ref, p8_ref,
                    out_ref):
    T = x_ref.shape[0]
    H = h0_ref.shape[-1]

    wx = wx_ref[...]
    wh = wh_ref[...]
    b = b_ref[...]
    g1 = g1_ref[...]
    b1 = b1_ref[...]          # forget-gate slice already includes F_BIAS
    g2 = g2_ref[...]
    b2 = b2_ref[...]
    s8 = s8_ref[...]          # (8H, 8) segmented [pre|pre^2] -> [mean|mean_sq]
    p8 = p8_ref[...]          # (8, 8H) broadcast [mean|mean_sq] back per gate

    # Hoisted input projection: all T matmuls are independent of the recurrence
    # and are issued before the serial loop (off the critical path).
    # TODO(synk): cast matmul operands to bf16 (keep f32 accumulation) at
    # production batch sizes.
    pre_x = [jnp.dot(x_ref[t], wx, preferred_element_type=jnp.float32) + b
             for t in range(T)]

    h = h0_ref[...]           # (Bb, H) carried in vregs across the unrolled loop
    c = c0_ref[...]

    for t in range(T):        # fully unrolled; T is small and static
        # Only the recurrent matmul remains on the per-step critical path.
        pre = pre_x[t] + jnp.dot(h, wh, preferred_element_type=jnp.float32)  # (Bb, 4H)

        # ln1: per-gate layer norm over each H-wide chunk of the 4H pre-act.
        # Segment mean / mean-of-squares via one MXU reduce + one MXU
        # broadcast (E[x^2] - E[x]^2 form, full lane width, no quarter-width
        # XLU reductions).
        both = jnp.concatenate([pre, pre * pre], axis=-1)                    # (Bb, 8H)
        stats = jnp.dot(both, s8, preferred_element_type=jnp.float32)        # (Bb, 8)
        stats_b = jnp.dot(stats, p8, preferred_element_type=jnp.float32)     # (Bb, 8H)
        m_b = stats_b[:, :4 * H]
        msq_b = stats_b[:, 4 * H:]
        var_b = msq_b - m_b * m_b
        ln1 = (pre - m_b) * jax.lax.rsqrt(var_b + LN_EPS) * g1 + b1          # (Bb, 4H)

        # Full-lane-width transcendentals (2 EUP pushes), then per-gate slices.
        sg = jax.nn.sigmoid(ln1)
        th = jnp.tanh(ln1)
        i_s = sg[:, 0 * H:1 * H]
        j_t = th[:, 1 * H:2 * H]
        f_s = sg[:, 2 * H:3 * H]   # F_BIAS folded into b1 in the wrapper
        o_s = sg[:, 3 * H:4 * H]

        cc = c * f_s + i_s * j_t                                             # (Bb, H)

        # ln2 over the H-wide cell state: two independent XLU reductions.
        m2 = jnp.mean(cc, axis=-1, keepdims=True)
        msq2 = jnp.mean(cc * cc, axis=-1, keepdims=True)
        v2 = msq2 - m2 * m2
        cc_ln = (cc - m2) * jax.lax.rsqrt(v2 + LN_EPS) * g2 + b2

        hh = jnp.tanh(cc_ln) * o_s

        # Deterministic (eval-mode) zoneout.
        # TODO(synk): training-mode stochastic zoneout (per-element Bernoulli
        # mask via pltpu.prng_seed / prng_random_bits) not implemented.
        h, c = (ZONEOUT_KEEP_H * hh + (1.0 - ZONEOUT_KEEP_H) * h,
                ZONEOUT_KEEP_C * cc_ln + (1.0 - ZONEOUT_KEEP_C) * c)

    # Single (Bb, 2H) output slab, written once per batch block.
    out_ref[:, :H] = h.astype(out_ref.dtype)
    out_ref[:, H:] = c.astype(out_ref.dtype)


def lstm_cell_seq(x_seq, h0, c0, w_full, bias, g1, b1, g2, b2, *, block_b=None):
    """Runs the LSTM cell over a (T, B, X) sequence in ONE pallas_call.

    Returns the final (new_h, new_c), each (B, H)."""
    T, B, X = x_seq.shape
    H = h0.shape[1]
    if block_b is None:
        # On v7x (2 TensorCores) split the batch into two blocks once B >= 16
        # (block_b must stay a multiple of 8); at B=8 there is a single block.
        block_b = B // 2 if (B >= 16 and (B // 2) % 8 == 0) else B
    assert B % block_b == 0, "batch must divide evenly into batch blocks"
    nb = B // block_b

    wx = w_full[:X, :]
    wh = w_full[X:, :]
    bias2 = bias.reshape(1, 4 * H)
    g1_2 = g1.reshape(1, 4 * H)
    # Fold the constant forget-gate bias into the post-LN beta (exact).
    b1_2 = b1.reshape(1, 4 * H).at[:, 2 * H:3 * H].add(F_BIAS)
    g2_2 = g2.reshape(1, H)
    b2_2 = b2.reshape(1, H)

    # Segmented-reduction helpers for ln1 (MXU-based, full lane width):
    #   [pre | pre^2] @ S8 -> (B, 8)  = [per-gate mean | per-gate mean_sq]
    #   stats @ P8        -> (B, 8H) = [mean broadcast | mean_sq broadcast]
    gate_ids = jnp.arange(4 * H, dtype=jnp.int32) // H
    s4 = (gate_ids[:, None] == jnp.arange(4)[None, :]).astype(jnp.float32) / H  # (4H, 4)
    p4 = (jnp.arange(4)[:, None] == gate_ids[None, :]).astype(jnp.float32)      # (4, 4H)
    z_s = jnp.zeros((4 * H, 4), jnp.float32)
    z_p = jnp.zeros((4, 4 * H), jnp.float32)
    s8 = jnp.block([[s4, z_s], [z_s, s4]])                                       # (8H, 8)
    p8 = jnp.block([[p4, z_p], [z_p, p4]])                                       # (8, 8H)

    def const_spec(*shape):
        return pl.BlockSpec(shape, lambda bi: (0,) * len(shape))

    out = pl.pallas_call(
        lstm_seq_kernel,
        out_shape=jax.ShapeDtypeStruct((B, 2 * H), jnp.float32),
        grid=(nb,),
        in_specs=[
            # Whole (T, block_b, X) x slab VMEM-resident per batch block.
            pl.BlockSpec((T, block_b, X), lambda bi: (0, bi, 0)),
            pl.BlockSpec((block_b, H), lambda bi: (bi, 0)),      # h0
            pl.BlockSpec((block_b, H), lambda bi: (bi, 0)),      # c0
            const_spec(X, 4 * H),        # wx
            const_spec(H, 4 * H),        # wh
            const_spec(1, 4 * H),        # bias
            const_spec(1, 4 * H),        # ln1 gamma
            const_spec(1, 4 * H),        # ln1 beta (+F_BIAS on forget slice)
            const_spec(1, H),            # ln2 gamma
            const_spec(1, H),            # ln2 beta
            const_spec(8 * H, 8),        # S8 segment reducer
            const_spec(8, 8 * H),        # P8 segment broadcaster
        ],
        out_specs=pl.BlockSpec((block_b, 2 * H), lambda bi: (bi, 0)),
        compiler_params=pltpu.CompilerParams(
            dimension_semantics=("parallel",)),
    )(x_seq, h0, c0, wx, wh, bias2, g1_2, b1_2, g2_2, b2_2, s8, p8)

    return out[:, :H], out[:, H:]


def lstm_cell(x, h, c, w_full, bias, g1, b1, g2, b2):
    """Single-step forward (exactly the PyTorch module's forward)."""
    return lstm_cell_seq(x[None], h, c, w_full, bias, g1, b1, g2, b2)


def lstm_cell_ref(x, h, c, w_full, bias, g1, b1, g2, b2):
    """Pure-JAX reference mirroring the PyTorch forward (single step)."""
    H = h.shape[1]
    concat = jnp.concatenate([x, h], axis=1) @ w_full + bias

    def ln(v, g, b):
        mu = jnp.mean(v, axis=-1, keepdims=True)
        var = jnp.mean((v - mu) ** 2, axis=-1, keepdims=True)
        return (v - mu) / jnp.sqrt(var + LN_EPS) * g + b

    parts = [ln(concat[:, k * H:(k + 1) * H],
                g1[k * H:(k + 1) * H], b1[k * H:(k + 1) * H]) for k in range(4)]
    i, j, f, o = parts
    new_c = c * jax.nn.sigmoid(f + F_BIAS) + jax.nn.sigmoid(i) * jnp.tanh(j)
    new_c = ln(new_c, g2, b2)
    new_h = jnp.tanh(new_c) * jax.nn.sigmoid(o)
    new_h = ZONEOUT_KEEP_H * new_h + (1.0 - ZONEOUT_KEEP_H) * h
    new_c = ZONEOUT_KEEP_C * new_c + (1.0 - ZONEOUT_KEEP_C) * c
    return new_h, new_c


if __name__ == "__main__":
    B, X, H, T = 8, 24, 32, 6

    key = jax.random.PRNGKey(0)
    kx, kh, kc, kw = jax.random.split(key, 4)

    x_seq = jax.random.normal(kx, (T, B, X), dtype=jnp.float32)
    h0 = jax.random.normal(kh, (B, H), dtype=jnp.float32)
    c0 = jax.random.normal(kc, (B, H), dtype=jnp.float32)

    # Deterministic parameter init (mirrors __init__ shapes):
    #   W_full: orthogonal [X + H, 4H], bias: zeros [4H],
    #   ln1 gamma/beta: ones/zeros [4H], ln2 gamma/beta: ones/zeros [H].
    w_full = jax.nn.initializers.orthogonal(scale=1.0)(kw, (X + H, 4 * H), jnp.float32)
    bias = jnp.zeros((4 * H,), jnp.float32)
    g1 = jnp.ones((4 * H,), jnp.float32)
    b1 = jnp.zeros((4 * H,), jnp.float32)
    g2 = jnp.ones((H,), jnp.float32)
    b2 = jnp.zeros((H,), jnp.float32)

    # --- single-step check (exact module forward) ---
    h1, c1 = lstm_cell(x_seq[0], h0, c0, w_full, bias, g1, b1, g2, b2)
    jax.block_until_ready((h1, c1))
    rh1, rc1 = lstm_cell_ref(x_seq[0], h0, c0, w_full, bias, g1, b1, g2, b2)
    assert jnp.allclose(h1, rh1, atol=1e-4, rtol=1e-4)
    assert jnp.allclose(c1, rc1, atol=1e-4, rtol=1e-4)

    # --- full sequence in a single pallas_call (time loop inside kernel) ---
    hT, cT = lstm_cell_seq(x_seq, h0, c0, w_full, bias, g1, b1, g2, b2)
    jax.block_until_ready((hT, cT))
    rh, rc = h0, c0
    for t in range(T):
        rh, rc = lstm_cell_ref(x_seq[t], rh, rc, w_full, bias, g1, b1, g2, b2)
    assert jnp.allclose(hT, rh, atol=1e-4, rtol=1e-4)
    assert jnp.allclose(cT, rc, atol=1e-4, rtol=1e-4)

    print("KERNEL_OK")
</pallas_src>

<mosaic_0001>
module attributes {stable_mosaic.version = 11 : i64} {
  func.func @lstm_seq_kernel(%arg0: i32, %arg1: memref<1x8x24xf32, #tpu.memory_space<vmem>>, %arg2: memref<8x32xf32, #tpu.memory_space<vmem>>, %arg3: memref<8x32xf32, #tpu.memory_space<vmem>>, %arg4: memref<24x128xf32, #tpu.memory_space<vmem>>, %arg5: memref<32x128xf32, #tpu.memory_space<vmem>>, %arg6: memref<1x128xf32, #tpu.memory_space<vmem>>, %arg7: memref<1x128xf32, #tpu.memory_space<vmem>>, %arg8: memref<1x128xf32, #tpu.memory_space<vmem>>, %arg9: memref<1x32xf32, #tpu.memory_space<vmem>>, %arg10: memref<1x32xf32, #tpu.memory_space<vmem>>, %arg11: memref<256x8xf32, #tpu.memory_space<vmem>>, %arg12: memref<8x256xf32, #tpu.memory_space<vmem>>, %arg13: memref<8x64xf32, #tpu.memory_space<vmem>>) attributes {dimension_semantics = [#tpu.dimension_semantics<parallel>], iteration_bounds = array<i64: 1>, scalar_prefetch = 0 : i64, scratch_operands = 0 : i64, tpu.core_type = #tpu.core_type<tc>, window_params = [{transform_indices = @transform_0, window_bounds = array<i64: 1, 8, 24>}, {transform_indices = @transform_1, window_bounds = array<i64: 8, 32>}, {transform_indices = @transform_2, window_bounds = array<i64: 8, 32>}, {pipeline_mode = #tpu.pipeline_mode<synchronous>, transform_indices = @transform_3, window_bounds = array<i64: 24, 128>}, {pipeline_mode = #tpu.pipeline_mode<synchronous>, transform_indices = @transform_4, window_bounds = array<i64: 32, 128>}, {pipeline_mode = #tpu.pipeline_mode<synchronous>, transform_indices = @transform_5, window_bounds = array<i64: 1, 128>}, {pipeline_mode = #tpu.pipeline_mode<synchronous>, transform_indices = @transform_6, window_bounds = array<i64: 1, 128>}, {pipeline_mode = #tpu.pipeline_mode<synchronous>, transform_indices = @transform_7, window_bounds = array<i64: 1, 128>}, {pipeline_mode = #tpu.pipeline_mode<synchronous>, transform_indices = @transform_8, window_bounds = array<i64: 1, 32>}, {pipeline_mode = #tpu.pipeline_mode<synchronous>, transform_indices = @transform_9, window_bounds = array<i64: 1, 32>}, {pipeline_mode = #tpu.pipeline_mode<synchronous>, transform_indices = @transform_10, window_bounds = array<i64: 256, 8>}, {pipeline_mode = #tpu.pipeline_mode<synchronous>, transform_indices = @transform_11, window_bounds = array<i64: 8, 256>}, {transform_indices = @transform_12, window_bounds = array<i64: 8, 64>}]} {
    %c0 = arith.constant 0 : index
    %c0_0 = arith.constant 0 : index
    %0 = vector.load %arg4[%c0, %c0_0] : memref<24x128xf32, #tpu.memory_space<vmem>>, vector<24x128xf32>
    %c0_1 = arith.constant 0 : index
    %c0_2 = arith.constant 0 : index
    %1 = vector.load %arg5[%c0_1, %c0_2] : memref<32x128xf32, #tpu.memory_space<vmem>>, vector<32x128xf32>
    %c0_3 = arith.constant 0 : index
    %c0_4 = arith.constant 0 : index
    %2 = vector.load %arg6[%c0_3, %c0_4] : memref<1x128xf32, #tpu.memory_space<vmem>>, vector<1x128xf32>
    %c0_5 = arith.constant 0 : index
    %c0_6 = arith.constant 0 : index
    %3 = vector.load %arg7[%c0_5, %c0_6] : memref<1x128xf32, #tpu.memory_space<vmem>>, vector<1x128xf32>
    %c0_7 = arith.constant 0 : index
    %c0_8 = arith.constant 0 : index
    %4 = vector.load %arg8[%c0_7, %c0_8] : memref<1x128xf32, #tpu.memory_space<vmem>>, vector<1x128xf32>
    %c0_9 = arith.constant 0 : index
    %c0_10 = arith.constant 0 : index
    %5 = vector.load %arg9[%c0_9, %c0_10] : memref<1x32xf32, #tpu.memory_space<vmem>>, vector<1x32xf32>
    %c0_11 = arith.constant 0 : index
    %c0_12 = arith.constant 0 : index
    %6 = vector.load %arg10[%c0_11, %c0_12] : memref<1x32xf32, #tpu.memory_space<vmem>>, vector<1x32xf32>
    %c0_13 = arith.constant 0 : index
    %c0_14 = arith.constant 0 : index
    %7 = vector.load %arg11[%c0_13, %c0_14] : memref<256x8xf32, #tpu.memory_space<vmem>>, vector<256x8xf32>
    %c0_15 = arith.constant 0 : index
    %c0_16 = arith.constant 0 : index
    %8 = vector.load %arg12[%c0_15, %c0_16] : memref<8x256xf32, #tpu.memory_space<vmem>>, vector<8x256xf32>
    %c0_17 = arith.constant 0 : index
    %c0_18 = arith.constant 0 : index
    %c0_19 = arith.constant 0 : index
    %9 = vector.load %arg1[%c0_17, %c0_18, %c0_19] : memref<1x8x24xf32, #tpu.memory_space<vmem>>, vector<1x8x24xf32>
    %10 = vector.shape_cast %9 : vector<1x8x24xf32> to vector<8x24xf32>
    %cst = arith.constant dense<0.000000e+00> : vector<8x128xf32>
    %11 = tpu.matmul %10, %0, %cst {dimension_numbers = #tpu.dot_dimension_numbers<[1], [0], [0], [1], [0, 0, 1, 1], [], []>} : vector<8x24xf32>, vector<24x128xf32>, vector<8x128xf32> -> vector<8x128xf32>
    %12 = vector.broadcast %2 : vector<1x128xf32> to vector<8x128xf32>
    %13 = arith.addf %11, %12 : vector<8x128xf32>
    %c0_20 = arith.constant 0 : index
    %c0_21 = arith.constant 0 : index
    %14 = vector.load %arg2[%c0_20, %c0_21] : memref<8x32xf32, #tpu.memory_space<vmem>>, vector<8x32xf32>
    %c0_22 = arith.constant 0 : index
    %c0_23 = arith.constant 0 : index
    %15 = vector.load %arg3[%c0_22, %c0_23] : memref<8x32xf32, #tpu.memory_space<vmem>>, vector<8x32xf32>
    %cst_24 = arith.constant dense<0.000000e+00> : vector<8x128xf32>
    %16 = tpu.matmul %14, %1, %cst_24 {dimension_numbers = #tpu.dot_dimension_numbers<[1], [0], [0], [1], [0, 0, 1, 1], [], []>} : vector<8x32xf32>, vector<32x128xf32>, vector<8x128xf32> -> vector<8x128xf32>
    %17 = arith.addf %13, %16 : vector<8x128xf32>
    %18 = arith.mulf %17, %17 : vector<8x128xf32>
    %19 = tpu.concatenate %17, %18 in 1 : vector<8x128xf32>, vector<8x128xf32> -> vector<8x256xf32>
    %cst_25 = arith.constant dense<0.000000e+00> : vector<8x8xf32>
    %20 = tpu.matmul %19, %7, %cst_25 {dimension_numbers = #tpu.dot_dimension_numbers<[1], [0], [0], [1], [0, 0, 1, 1], [], []>} : vector<8x256xf32>, vector<256x8xf32>, vector<8x8xf32> -> vector<8x8xf32>
    %cst_26 = arith.constant dense<0.000000e+00> : vector<8x256xf32>
    %21 = tpu.matmul %20, %8, %cst_26 {dimension_numbers = #tpu.dot_dimension_numbers<[1], [0], [0], [1], [0, 0, 1, 1], [], []>} : vector<8x8xf32>, vector<8x256xf32>, vector<8x256xf32> -> vector<8x256xf32>
    %22 = vector.extract_strided_slice %21 {offsets = [0, 0], sizes = [8, 128], strides = [1, 1]} : vector<8x256xf32> to vector<8x128xf32>
    %23 = vector.extract_strided_slice %21 {offsets = [0, 128], sizes = [8, 128], strides = [1, 1]} : vector<8x256xf32> to vector<8x128xf32>
    %24 = arith.mulf %22, %22 : vector<8x128xf32>
    %25 = arith.subf %23, %24 : vector<8x128xf32>
    %26 = arith.subf %17, %22 : vector<8x128xf32>
    %cst_27 = arith.constant 9.99999974E-6 : f32
    %27 = vector.broadcast %cst_27 : f32 to vector<8x128xf32>
    %28 = arith.addf %25, %27 : vector<8x128xf32>
    %29 = math.rsqrt %28 : vector<8x128xf32>
    %30 = arith.mulf %26, %29 : vector<8x128xf32>
    %31 = vector.broadcast %3 : vector<1x128xf32> to vector<8x128xf32>
    %32 = arith.mulf %30, %31 : vector<8x128xf32>
    %33 = vector.broadcast %4 : vector<1x128xf32> to vector<8x128xf32>
    %34 = arith.addf %32, %33 : vector<8x128xf32>
    %35 = arith.negf %34 : vector<8x128xf32>
    %36 = math.exp %35 : vector<8x128xf32>
    %cst_28 = arith.constant 1.000000e+00 : f32
    %37 = vector.broadcast %cst_28 : f32 to vector<8x128xf32>
    %38 = arith.addf %37, %36 : vector<8x128xf32>
    %39 = arith.divf %37, %38 : vector<8x128xf32>
    %40 = math.tanh %34 : vector<8x128xf32>
    %41 = vector.extract_strided_slice %39 {offsets = [0, 0], sizes = [8, 32], strides = [1, 1]} : vector<8x128xf32> to vector<8x32xf32>
    %42 = vector.extract_strided_slice %40 {offsets = [0, 32], sizes = [8, 32], strides = [1, 1]} : vector<8x128xf32> to vector<8x32xf32>
    %43 = vector.extract_strided_slice %39 {offsets = [0, 64], sizes = [8, 32], strides = [1, 1]} : vector<8x128xf32> to vector<8x32xf32>
    %44 = vector.extract_strided_slice %39 {offsets = [0, 96], sizes = [8, 32], strides = [1, 1]} : vector<8x128xf32> to vector<8x32xf32>
    %45 = arith.mulf %15, %43 : vector<8x32xf32>
    %46 = arith.mulf %41, %42 : vector<8x32xf32>
    %47 = arith.addf %45, %46 : vector<8x32xf32>
    %cst_29 = arith.constant dense<0.000000e+00> : vector<8xf32>
    %48 = vector.multi_reduction <add>, %47, %cst_29 [1] : vector<8x32xf32> to vector<8xf32>
    %49 = vector.shape_cast %48 : vector<8xf32> to vector<8x1xf32>
    %cst_30 = arith.constant 3.200000e+01 : f32
    %50 = vector.broadcast %cst_30 : f32 to vector<8x1xf32>
    %51 = arith.divf %49, %50 : vector<8x1xf32>
    %52 = arith.mulf %47, %47 : vector<8x32xf32>
    %cst_31 = arith.constant dense<0.000000e+00> : vector<8xf32>
    %53 = vector.multi_reduction <add>, %52, %cst_31 [1] : vector<8x32xf32> to vector<8xf32>
    %54 = vector.shape_cast %53 : vector<8xf32> to vector<8x1xf32>
    %cst_32 = arith.constant 3.200000e+01 : f32
    %55 = vector.broadcast %cst_32 : f32 to vector<8x1xf32>
    %56 = arith.divf %54, %55 : vector<8x1xf32>
    %57 = arith.mulf %51, %51 : vector<8x1xf32>
    %58 = arith.subf %56, %57 : vector<8x1xf32>
    %59 = vector.broadcast %51 : vector<8x1xf32> to vector<8x32xf32>
    %60 = arith.subf %47, %59 : vector<8x32xf32>
    %cst_33 = arith.constant 9.99999974E-6 : f32
    %61 = vector.broadcast %cst_33 : f32 to vector<8x1xf32>
    %62 = arith.addf %58, %61 : vector<8x1xf32>
    %63 = math.rsqrt %62 : vector<8x1xf32>
    %64 = vector.broadcast %63 : vector<8x1xf32> to vector<8x32xf32>
    %65 = arith.mulf %60, %64 : vector<8x32xf32>
    %66 = vector.broadcast %5 : vector<1x32xf32> to vector<8x32xf32>
    %67 = arith.mulf %65, %66 : vector<8x32xf32>
    %68 = vector.broadcast %6 : vector<1x32xf32> to vector<8x32xf32>
    %69 = arith.addf %67, %68 : vector<8x32xf32>
    %70 = math.tanh %69 : vector<8x32xf32>
    %71 = arith.mulf %70, %44 : vector<8x32xf32>
    %cst_34 = arith.constant 0.699999988 : f32
    %72 = vector.broadcast %cst_34 : f32 to vector<8x32xf32>
    %73 = arith.mulf %72, %71 : vector<8x32xf32>
    %cst_35 = arith.constant 3.000000e-01 : f32
    %74 = vector.broadcast %cst_35 : f32 to vector<8x32xf32>
    %75 = arith.mulf %74, %14 : vector<8x32xf32>
    %76 = arith.addf %73, %75 : vector<8x32xf32>
    %cst_36 = arith.constant 0.699999988 : f32
    %77 = vector.broadcast %cst_36 : f32 to vector<8x32xf32>
    %78 = arith.mulf %77, %69 : vector<8x32xf32>
    %cst_37 = arith.constant 3.000000e-01 : f32
    %79 = vector.broadcast %cst_37 : f32 to vector<8x32xf32>
    %80 = arith.mulf %79, %15 : vector<8x32xf32>
    %81 = arith.addf %78, %80 : vector<8x32xf32>
    %c0_38 = arith.constant 0 : index
    %c0_39 = arith.constant 0 : index
    %82 = vector.load %arg13[%c0_38, %c0_39] : memref<8x64xf32, #tpu.memory_space<vmem>>, vector<8x32xf32>
    tpu.vector_store %arg13[%c0_38, %c0_39], %76 {strides = array<i32>} : memref<8x64xf32, #tpu.memory_space<vmem>>, vector<8x32xf32>,
    %c0_40 = arith.constant 0 : index
    %c32 = arith.constant 32 : index
    %83 = vector.load %arg13[%c0_40, %c32] : memref<8x64xf32, #tpu.memory_space<vmem>>, vector<8x32xf32>
    tpu.vector_store %arg13[%c0_40, %c32], %81 {strides = array<i32>} : memref<8x64xf32, #tpu.memory_space<vmem>>, vector<8x32xf32>,
    return
  }
  func.func @transform_0(%arg0: i32) -> (i32, i32, i32) {
    %c0_i32 = arith.constant 0 : i32
    %c0_i32_0 = arith.constant 0 : i32
    %c0_i32_1 = arith.constant 0 : i32
    return %c0_i32, %arg0, %c0_i32_0 : i32, i32, i32
  }
  func.func @transform_1(%arg0: i32) -> (i32, i32) {
    %c0_i32 = arith.constant 0 : i32
    %c0_i32_0 = arith.constant 0 : i32
    return %arg0, %c0_i32 : i32, i32
  }
  func.func @transform_2(%arg0: i32) -> (i32, i32) {
    %c0_i32 = arith.constant 0 : i32
    %c0_i32_0 = arith.constant 0 : i32
    return %arg0, %c0_i32 : i32, i32
  }
  func.func @transform_3(%arg0: i32) -> (i32, i32) {
    %c0_i32 = arith.constant 0 : i32
    %c0_i32_0 = arith.constant 0 : i32
    %c0_i32_1 = arith.constant 0 : i32
    return %c0_i32, %c0_i32_0 : i32, i32
  }
  func.func @transform_4(%arg0: i32) -> (i32, i32) {
    %c0_i32 = arith.constant 0 : i32
    %c0_i32_0 = arith.constant 0 : i32
    %c0_i32_1 = arith.constant 0 : i32
    return %c0_i32, %c0_i32_0 : i32, i32
  }
  func.func @transform_5(%arg0: i32) -> (i32, i32) {
    %c0_i32 = arith.constant 0 : i32
    %c0_i32_0 = arith.constant 0 : i32
    %c0_i32_1 = arith.constant 0 : i32
    return %c0_i32, %c0_i32_0 : i32, i32
  }
  func.func @transform_6(%arg0: i32) -> (i32, i32) {
    %c0_i32 = arith.constant 0 : i32
    %c0_i32_0 = arith.constant 0 : i32
    %c0_i32_1 = arith.constant 0 : i32
    return %c0_i32, %c0_i32_0 : i32, i32
  }
  func.func @transform_7(%arg0: i32) -> (i32, i32) {
    %c0_i32 = arith.constant 0 : i32
    %c0_i32_0 = arith.constant 0 : i32
    %c0_i32_1 = arith.constant 0 : i32
    return %c0_i32, %c0_i32_0 : i32, i32
  }
  func.func @transform_8(%arg0: i32) -> (i32, i32) {
    %c0_i32 = arith.constant 0 : i32
    %c0_i32_0 = arith.constant 0 : i32
    %c0_i32_1 = arith.constant 0 : i32
    return %c0_i32, %c0_i32_0 : i32, i32
  }
  func.func @transform_9(%arg0: i32) -> (i32, i32) {
    %c0_i32 = arith.constant 0 : i32
    %c0_i32_0 = arith.constant 0 : i32
    %c0_i32_1 = arith.constant 0 : i32
    return %c0_i32, %c0_i32_0 : i32, i32
  }
  func.func @transform_10(%arg0: i32) -> (i32, i32) {
    %c0_i32 = arith.constant 0 : i32
    %c0_i32_0 = arith.constant 0 : i32
    %c0_i32_1 = arith.constant 0 : i32
    return %c0_i32, %c0_i32_0 : i32, i32
  }
  func.func @transform_11(%arg0: i32) -> (i32, i32) {
    %c0_i32 = arith.constant 0 : i32
    %c0_i32_0 = arith.constant 0 : i32
    %c0_i32_1 = arith.constant 0 : i32
    return %c0_i32, %c0_i32_0 : i32, i32
  }
  func.func @transform_12(%arg0: i32) -> (i32, i32) {
    %c0_i32 = arith.constant 0 : i32
    %c0_i32_0 = arith.constant 0 : i32
    return %arg0, %c0_i32 : i32, i32
  }
}

</mosaic_0001>

<bundles_post_ra>
// kernel: tpu_custom_call.1
= control target key start
LH: loop header
LB: loop body
LE: loop exit
PB: predicated region body
PF: predicated region fallthrough
CT: control target
= control target key end

     0   :  { %v605_v1 = vmov 0.0   ;;  %vm606_vm0 = vmmov 0   ;;  %vm95_vm1 = vcmask 195584   ;;  %s838_s0 = inlined_call_operand.vmem [shape: f32[1,8,24], index: 0, kind: input, shape index: {}]   ;;  %s839_s1 = inlined_call_operand.vmem [shape: f32[8,32], index: 1, kind: input, shape index: {}]   ;;  %s840_s2 = inlined_call_operand.vmem [shape: f32[8,32], index: 2, kind: input, shape index: {}]   ;;  %s841_s3 = inlined_call_operand.vmem [shape: f32[24,128], index: 3, kind: input, shape index: {}]   ;;  %s842_s4 = inlined_call_operand.vmem [shape: f32[32,128], index: 4, kind: input, shape index: {}]   ;;  %s843_s5 = inlined_call_operand.vmem [shape: f32[1,128], index: 5, kind: input, shape index: {}]   ;;  %s844_s6 = inlined_call_operand.vmem [shape: f32[1,128], index: 6, kind: input, shape index: {}]   ;;  %s845_s7 = inlined_call_operand.vmem [shape: f32[1,128], index: 7, kind: input, shape index: {}]   ;;  %s846_s8 = inlined_call_operand.vmem [shape: f32[1,32], index: 8, kind: input, shape index: {}]   ;;  %s847_s9 = inlined_call_operand.vmem [shape: f32[1,32], index: 9, kind: input, shape index: {}]   ;;  %s848_s10 = inlined_call_operand.vmem [shape: f32[256,8], index: 10, kind: input, shape index: {}]   ;;  %s849_s11 = inlined_call_operand.vmem [shape: f32[8,256], index: 11, kind: input, shape index: {}]   ;;  %s850_s12 = inlined_call_operand.hbm [shape: f32[8,64], index: 12, kind: output, shape index: {}]  }
   0x1   :  { %v44_v0 = vld [vmem:[%s841_s3 + $0x10] sm:$0xff]  ;;  %545 = vmatprep.subr.mxu1 %v605_v1  ;;  %v43_v2 = vld [vmem:[%s841_s3 + $0x8] sm:$0xff]  ;;  %551 = vmatprep.mubr.msk.f32.mxu1 %vm606_vm0, %v605_v1  ;;  %v42_v3 = vld [vmem:[%s841_s3] sm:$0xff] }
   0x2   :  { %546 = vmatpush3.msra.mxu1 %v44_v0  ;;  %v85_v4 = vld [vmem:[%s848_s10 + $0xf8] sm:$0xff]  ;;  %v84_v6 = vld [vmem:[%s848_s10 + $0xf0] sm:$0xff]  ;;  %v88_v7 = vld [vmem:[%s838_s0] sm:$0xff] }
   0x3   :  { %547 = vmatprep.subr.mxu1 %v605_v1  ;;  %v69_v5 = vld [vmem:[%s848_s10 + $0x78] sm:$0xff]  ;;  %510 = vmatprep.subr.mxu0 %v85_v4  ;;  %v68_v9 = vld [vmem:[%s848_s10 + $0x70] sm:$0xff]  ;;  %v83_v11 = vld [vmem:[%s848_s10 + $0xe8] sm:$0xff] }
   0x4   :  { %548 = vmatpush3.msra.mxu1 %v43_v2  ;;  %v48_v8 = vld [vmem:[%s842_s4 + $0x18] sm:$0xff]  ;;  %511 = vmatpush3.msra.mxu0 %v69_v5  ;;  %v47_v10 = vld [vmem:[%s842_s4 + $0x10] sm:$0xff]  ;;  %v67_v12 = vld [vmem:[%s848_s10 + $0x68] sm:$0xff] }
   0x5   :  { %549 = vmatprep.subr.mxu1 %v605_v1  ;;  %512 = vmatprep.subr.mxu0 %v84_v6  ;;  %v46_v13 = vld [vmem:[%s842_s4 + $0x8] sm:$0xff]  ;;  %v82_v14 = vld [vmem:[%s848_s10 + $0xe0] sm:$0xff] }
   0x6   :  { %550 = vmatpush3.msra.mxu1 %v42_v3  ;;  %513 = vmatpush3.msra.mxu0 %v68_v9 }
   0x7   :  { %552 = vmatmul.mubr.msk.f32.vlgmr.msra.gmra.mxu1 %vm95_vm1, %v88_v7  ;;  %554 = vmatprep.subr.mxu1 %v605_v1 }
   0x8   :  { %555 = vmatpush3.msra.mxu1 %v48_v8  ;;  %562 = vmatprep.mubr.msk.f32.mxu1 %vm606_vm0, %v605_v1 }
   0x9   :  { %556 = vmatprep.subr.mxu1 %v605_v1 }
   0xa   :  { %17 = vsyncpa [#allocation3], 0  ;;  %557 = vmatpush3.msra.mxu1 %v47_v10  ;;  %514 = vmatprep.subr.mxu0 %v83_v11  ;;  %v66_v15 = vld [vmem:[%s848_s10 + $0x60] sm:$0xff]  ;;  %v81_v17 = vld [vmem:[%s848_s10 + $0xd8] sm:$0xff]  ;;  %vm171_vm2 = vcmask 261120   ;;  %vm317_vm3 = vcmask 64512  }
   0xb   :  { %558 = vmatprep.subr.mxu1 %v605_v1  ;;  %v45_v16 = vld [vmem:[%s842_s4] sm:$0xff]  ;;  %515 = vmatpush3.msra.mxu0 %v67_v12  ;;  %v65_v19 = vld [vmem:[%s848_s10 + $0x58] sm:$0xff]  ;;  %v80_v20 = vld [vmem:[%s848_s10 + $0xd0] sm:$0xff]  ;;  %s607_s24 = smov 64   ;;  %s608_s25 = smov 96   ;;  %vm476_vm4 = vcmask 523520  }
   0xc   :  { %559 = vmatpush3.msra.mxu1 %v46_v13  ;;  %v732_v18 = vld [vmem:[%s839_s1] sm:$0xff]  ;;  %516 = vmatprep.subr.mxu0 %v82_v14  ;;  %v64_v21 = vld [vmem:[%s848_s10 + $0x50] sm:$0xff]  ;;  %v79_v22 = vld [vmem:[%s848_s10 + $0xc8] sm:$0xff] }
   0xd   :  { %560 = vmatprep.subr.mxu1 %v605_v1  ;;  %517 = vmatpush3.msra.mxu0 %v66_v15  ;;  %v63_v23 = vld [vmem:[%s848_s10 + $0x48] sm:$0xff]  ;;  %v78_v24 = vld [vmem:[%s848_s10 + $0xc0] sm:$0xff]  ;;  %v77_v26 = vld [vmem:[%s848_s10 + $0xb8] sm:$0xff] }
   0xe   :  { %561 = vmatpush3.msra.mxu1 %v45_v16  ;;  %518 = vmatprep.subr.mxu0 %v81_v17  ;;  %v62_v25 = vld [vmem:[%s848_s10 + $0x40] sm:$0xff]  ;;  %v61_v27 = vld [vmem:[%s848_s10 + $0x38] sm:$0xff]  ;;  %v76_v28 = vld [vmem:[%s848_s10 + $0xb0] sm:$0xff] }
   0xf   :  { %563 = vmatmul.mubr.msk.f32.vlgmr.msra.gmra.mxu1 %vm171_vm2, %v732_v18  ;;  %519 = vmatpush3.msra.mxu0 %v65_v19  ;;  %v60_v29 = vld [vmem:[%s848_s10 + $0x30] sm:$0xff]  ;;  %v75_v30 = vld [vmem:[%s848_s10 + $0xa8] sm:$0xff]  ;;  %v74_v32 = vld [vmem:[%s848_s10 + $0xa0] sm:$0xff] }
  0x10   :  { %520 = vmatprep.subr.mxu0 %v80_v20  ;;  %385 = vmatprep.mubr.f32.mxu1 %v605_v1  ;;  %v59_v31 = vld [vmem:[%s848_s10 + $0x28] sm:$0xff]  ;;  %v58_v33 = vld [vmem:[%s848_s10 + $0x20] sm:$0xff]  ;;  %v73_v34 = vld [vmem:[%s848_s10 + $0x98] sm:$0xff] }
  0x11   :  { %521 = vmatpush3.msra.mxu0 %v64_v21  ;;  %v57_v35 = vld [vmem:[%s848_s10 + $0x18] sm:$0xff]  ;;  %v72_v36 = vld [vmem:[%s848_s10 + $0x90] sm:$0xff]  ;;  %v71_v38 = vld [vmem:[%s848_s10 + $0x88] sm:$0xff] }
  0x12   :  { %522 = vmatprep.subr.mxu0 %v79_v22  ;;  %v56_v37 = vld [vmem:[%s848_s10 + $0x10] sm:$0xff]  ;;  %v55_v39 = vld [vmem:[%s848_s10 + $0x8] sm:$0xff]  ;;  %v70_v40 = vld [vmem:[%s848_s10 + $0x80] sm:$0xff] }
  0x13   :  { %523 = vmatpush3.msra.mxu0 %v63_v23  ;;  %v54_v41 = vld [vmem:[%s848_s10] sm:$0xff]  ;;  %v87_v50 = vld [vmem:[%s849_s11 + $0x8] sm:$0xff] }
  0x14   :  { %524 = vmatprep.subr.mxu0 %v78_v24  ;;  %v492_v44 = vld [vmem:[%s843_s5] ss:$0 sm:$0xff]  ;;  %351 = vmatprep.subr.mxu1 %v87_v50 }
  0x15   :  { %525 = vmatpush3.msra.mxu0 %v62_v25  ;;  %v86_v51 = vld [vmem:[%s849_s11] sm:$0xff] }
  0x16   :  { %526 = vmatprep.subr.mxu0 %v77_v26  ;;  %352 = vmatpush1.msra.mxu1 %v86_v51  ;;  %v496_v62 = vld [vmem:[%s844_s6] ss:$0 sm:$0xff]  ;;  %s609_s6 = smov 32  }
  0x17   :  { %527 = vmatpush3.msra.mxu0 %v61_v27  ;;  %v497_v0 = vld [vmem:[%s845_s7] ss:$0 sm:$0xff] }
  0x18   :  { %528 = vmatprep.subr.mxu0 %v76_v28  ;;  %v170_v9 = vld [vmem:[%s840_s2] sm:$0xff] }
  0x19   :  { %529 = vmatpush3.msra.mxu0 %v60_v29  ;;  %v499_v27 = vld [vmem:[%s846_s8] ss:$0 sm:$0xff]  ;;  %s610_s8 = smov [#allocation2]  }
  0x1a   :  { %530 = vmatprep.subr.mxu0 %v75_v30  ;;  %v500_v29 = vld [vmem:[%s847_s9] ss:$0 sm:$0xff]  ;;  %s484_s30 = sshll.u32 %s610_s8, 4  ;;  %s485_s30 = int_to_ptr.vmem [resolvable:$true] %s484_s30 }
  0x1b   :  { %531 = vmatpush3.msra.mxu0 %v59_v31  ;;  %v469_v31 = vmul.f32 0.3, %v170_v9  ;;  %s583_s9 = scalar_lea.vmem %s485_s30, 128  ;;  %p588_p1 = scmp.lt.s32.totalorder %s485_s30, %s485_s30 }
  0x1c   :  { %532 = vmatprep.subr.mxu0 %v74_v32  ;;  %p584_p0 = scmp.ne.s32.totalorder %s485_s30, %s583_s9  ;;  %p589_p2 = scmp.lt.s32.totalorder %s583_s9, %s583_s9 }
  0x1d   :  { %533 = vmatpush3.msra.mxu0 %v58_v33 }
  0x1e   :  { %534 = vmatprep.subr.mxu0 %v73_v34  ;;  %p590_p3 = por %p589_p2, %p588_p1 }
  0x1f   :  { %535 = vmatpush3.msra.mxu0 %v57_v35 }
  0x20   :  { %536 = vmatprep.subr.mxu0 %v72_v36  ;;  %p591_p4 = pnand %p590_p3, %p584_p0 }
  0x21   :  { %537 = vmatpush3.msra.mxu0 %v56_v37  ;;  %v466_v37 = vmul.f32 0.3, %v732_v18 }
  0x22   :  { %538 = vmatprep.subr.mxu0 %v71_v38 }
  0x23   :  { %539 = vmatpush3.msra.mxu0 %v55_v39 }
  0x24   :  { %540 = vmatprep.subr.mxu0 %v70_v40 }
  0x25   :  { %541 = vmatpush3.msra.mxu0 %v54_v41 }
  0xc7   :  { %v165_v42 = vpop.f32.mrf.mxu1 }
  0xc8   :  { %v166_v45 = vadd.f32 %v492_v44, %v165_v42 }
  0xc9   :  { %v553_v43 = vpop.f32.mrf.mxu1 }
  0xcf   :  { %v241_v46 = vpop.f32.mrf.mxu1 }
  0xd0   :  { %v245_v47 = vadd.f32 %v241_v46, %v166_v45 }
  0xd1   :  { %v564_v48 = vpop.f32.mrf.mxu1 }
  0xd2   :  { %v246_v49 = vmul.f32 %v245_v47, %v245_v47 }
  0xd4   :  { %311 = vmatprep.mubr.f32.mxu0 %v246_v49 }
  0xd5   :  { %312 = vmatmul.mubr.f32.vlgmr.msra.gmra.mxu0 %v245_v47 }
 0x195   :  { %v542_v52 = vpop.f32.mrf.mxu0 }
 0x197   :  { %v543_v53 = vpop.f32.mrf.mxu0 }
 0x198   :  { %v544_v54 = vadd.f32 %v543_v53, %v542_v52 }
 0x19a   :  { %495 = vmatmul.mubr.msk.f32.vlgmr.msra.gmra.mxu1 %vm317_vm3, %v544_v54 }
 0x25a   :  { %v387_v55 = vpop.f32.mrf.mxu1 }
 0x25b   :  { %v392_v56 = vmul.f32 %v387_v55, %v387_v55  ;;  %v394_v60 = vsub.f32 %v245_v47, %v387_v55 }
 0x25c   :  { %v389_v57 = vpop.f32.mrf.mxu1 }
 0x25d   :  { %v393_v58 = vsub.f32 %v389_v57, %v392_v56 }
 0x25f   :  { %v395_v59 = vadd.f32 1e-05, %v393_v58 }
 0x261   :  { %571 = vrsqrt.f32 %v395_v59 }
 0x26e   :  { %v572_v61 = vpop.eup %571 }
 0x26f   :  { %v397_v63 = vmul.f32 %v572_v61, %v394_v60 }
 0x271   :  { %v404_v1 = vmul.f32 %v496_v62, %v397_v63 }
 0x273   :  { %v411_v2 = vadd.f32 %v497_v0, %v404_v1 }
 0x275   :  { %v498_v3 = vmul.f32 -1.442695, %v411_v2 }
 0x277   :  { %573 = vpow2.f32 %v498_v3 }
 0x284   :  { %v574_v4 = vpop.eup %573 }
 0x285   :  { %v415_v5 = vadd.f32 1.0, %v574_v4 }
 0x287   :  { %575 = vrcp.f32 %v415_v5 }
 0x288   :  { %577 = vtanh.f32 %v411_v2 }
 0x294   :  { %v576_v6 = vpop.eup %575 }
 0x295   :  { %420 = vrot.lane.b32.xlu0 %v576_v6, %s607_s24  ;;  %v578_v7 = vpop.eup %577 }
 0x299   :  { %425 = vrot.lane.b32.xlu0 %v578_v7, %s608_s25 }
 0x29d   :  { %461 = vrot.lane.b32.xlu0 %v576_v6, %s609_s6 }
 0x307   :  { %v421_v8 = vpop.permute.xlu0 %420 }
 0x308   :  { %v423_v11 = vmul.f32 %v421_v8, %v170_v9 }
 0x30b   :  { %v426_v10 = vpop.permute.xlu0 %425 }
 0x30c   :  { %v428_v12 = vmul.f32 %v576_v6, %v426_v10 }
 0x30e   :  { %v429_v13 = vadd.f32 %v428_v12, %v423_v11 }
 0x30f   :  { %v462_v36 = vpop.permute.xlu0 %461 }
 0x310   :  { %v430_v14 = vsel %vm171_vm2, %v429_v13, 0.0  ;;  %v435_v15 = vmul.f32 %v429_v13, %v429_v13 }
 0x311   :  { %431 = vadd.xlane.f32.xlu1 %v430_v14 }
 0x312   :  { %v436_v16 = vsel %vm171_vm2, %v435_v15, 0.0 }
 0x315   :  { %437 = vadd.xlane.f32.xlu1 %v436_v16 }
 0x39a   :  { %v432_v17 = vpop.xlane.xlu1 %431 }
 0x39b   :  { %v434_v19 = vmul.f32 0.03125, %v432_v17 }
 0x39d   :  { %v440_v21 = vmul.f32 %v434_v19, %v434_v19  ;;  %v442_v25 = vsub.f32 %v429_v13, %v434_v19 }
 0x39e   :  { %v438_v20 = vpop.xlane.xlu1 %437 }
 0x39f   :  { %v439_v22 = vmul.f32 0.03125, %v438_v20 }
 0x3a1   :  { %v441_v23 = vsub.f32 %v439_v22, %v440_v21 }
 0x3a3   :  { %v443_v24 = vadd.f32 1e-05, %v441_v23 }
 0x3a5   :  { %579 = vrsqrt.f32 %v443_v24 }
 0x3b2   :  { %v580_v26 = vpop.eup %579 }
 0x3b3   :  { %v445_v28 = vmul.f32 %v580_v26, %v442_v25 }
 0x3b5   :  { %v452_v30 = vmul.f32 %v499_v27, %v445_v28 }
 0x3b7   :  { %v459_v32 = vadd.f32 %v500_v29, %v452_v30 }
 0x3b9   :  { %v468_v33 = vmul.f32 0.7, %v459_v32  ;;  %581 = vtanh.f32 %v459_v32 }
 0x3bb   :  { %v470_v34 = vadd.f32 %v469_v31, %v468_v33 }
 0x3bd   :  { %473 = vrot.lane.b32.xlu1 %v470_v34, %s609_s6 }
 0x3c6   :  { %v582_v35 = vpop.eup %581 }
 0x3c7   :  { %v464_v38 = vmul.f32 %v582_v35, %v462_v36 }
 0x3c9   :  { %v465_v39 = vmul.f32 0.7, %v464_v38 }
 0x3cb   :  { %v467_v40 = vadd.f32 %v466_v37, %v465_v39 }
 0x3cd   :  { %471 = vst.msk [vmem:[#allocation2] sm:$0xff] %vm171_vm2, %v467_v40 }
 0x42f   :  { %v474_v41 = vpop.permute.xlu1 %473 }
 0x430   :  { %477 = vst.msk [vmem:[#allocation2] sm:$0xff] %vm476_vm4, %v474_v41 }
 0x431   :  { %594 = shalt.err (!%p591_p4)
}
 0x432   :  { %487 = dma.vmem_to_hbm [thread:$0]  %s485_s30, 128, %s850_s12, [#allocation3]  }
 0x433   :  { %603 = dma.done.wait [#allocation3], 128  }
 0x434   :  { %604 = vsyncadd [#allocation3], 4294967168 }
 0x435   :  { %491 = vsyncpa [#allocation3], 1 }

</bundles_post_ra>
